<compile_context>
chip_gen: v7x
topology: tpu7x:2x2x1
jax: 0.10.0
libtpu: 0.0.40
codegen_flags: <defaults>
</compile_context>

<pallas_src>
import math

import jax
import jax.numpy as jnp
from jax.experimental import pallas as pl
from jax.experimental.pallas import tpu as pltpu


def _sincos_pos_embed_kernel(crd_ref, freq_x_ref, freq_y_ref, cos_mask_ref, out_ref):
    # crd_ref      : (tile_b, 2) f32            -- x in col 0, y in col 1
    # freq_x_ref   : (1, C) f32                 -- f tiled in cols [0, C/2), 0 elsewhere
    # freq_y_ref   : (1, C) f32                 -- 0 in [0, C/2), f tiled in [C/2, C)
    # cos_mask_ref : (1, C) f32                 -- 1.0 on cos columns, 0.0 on sin columns
    # out_ref      : (tile_b, C)
    x = crd_ref[:, 0:1]                          # (tile_b, 1)
    y = crd_ref[:, 1:2]                          # (tile_b, 1)
    # Lane-dense angle over the full channel width.  Exact: in every column one of the
    # two frequencies is exactly 0, so t == fl(x*f) or fl(y*f) bit-for-bit.
    t = x * freq_x_ref[...] + y * freq_y_ref[...]          # (tile_b, C), f32 on VPU
    emb = jnp.where(cos_mask_ref[...] > 0.5, jnp.cos(t), jnp.sin(t))
    out_ref[...] = emb.astype(out_ref.dtype)


def sincos_2d_pos_embed(crd, num_channels=256, min_period=0.001, max_period=10.0,
                        *, tile_b=2048, out_dtype=None):
    """Pallas equivalent of SinCos2DPosEmbed.forward.

    Args:
      crd: (B, 2) float array.
      tile_b: rows per grid step (multiple of 8). 2048 rows x 256 ch x f32 = 2 MiB per
        output block (4 MiB double-buffered) -- safe on v5e/v6e (128 MiB VMEM) and
        v7x (64 MiB VMEM / 32 MiB scoped default).
      out_dtype: output dtype (default: crd.dtype). bf16 halves write bytes on the
        mem-bound path; internal math is always f32.
    Returns:
      (B, num_channels) array.
    """
    if num_channels % 4 != 0:
        raise ValueError("num_channels must be divisible by 4")
    B = crd.shape[0]
    half_dim = num_channels // 4
    out_dtype = crd.dtype if out_dtype is None else out_dtype

    # Force f32 for the coordinates and all derived constants (bf16 is numerically
    # unacceptable for frequencies up to 2*pi/0.001).
    crd32 = crd.astype(jnp.float32)

    # Parameter-free module: the only "weights" are the deterministic frequencies,
    # precomputed in plain JAX exactly as torch.logspace(..., base=e).
    period = jnp.exp(
        jnp.linspace(math.log(min_period), math.log(max_period), half_dim, dtype=jnp.float32)
    )
    f = (2.0 * math.pi) / period                              # (half_dim,) f32
    zeros = jnp.zeros((half_dim,), jnp.float32)
    ones = jnp.ones((half_dim,), jnp.float32)
    # Output column layout: [sin(x f) | cos(x f) | sin(y f) | cos(y f)]
    freq_x = jnp.concatenate([f, f, zeros, zeros]).reshape(1, num_channels)
    freq_y = jnp.concatenate([zeros, zeros, f, f]).reshape(1, num_channels)
    cos_mask = jnp.concatenate([zeros, ones, zeros, ones]).reshape(1, num_channels)

    # Tile size: multiple of 8 sublanes, never larger than (B rounded up to 8).
    tile_b = min(int(tile_b), ((B + 7) // 8) * 8)
    tile_b = max(8, (tile_b // 8) * 8)
    grid = (pl.cdiv(B, tile_b),)

    return pl.pallas_call(
        _sincos_pos_embed_kernel,
        out_shape=jax.ShapeDtypeStruct((B, num_channels), out_dtype),
        grid=grid,
        in_specs=[
            pl.BlockSpec((tile_b, 2), lambda i: (i, 0)),               # per-tile rows
            pl.BlockSpec((1, num_channels), lambda i: (0, 0)),          # VMEM-resident consts
            pl.BlockSpec((1, num_channels), lambda i: (0, 0)),
            pl.BlockSpec((1, num_channels), lambda i: (0, 0)),
        ],
        out_specs=pl.BlockSpec((tile_b, num_channels), lambda i: (i, 0)),
        compiler_params=pltpu.CompilerParams(
            dimension_semantics=("parallel",),   # shards row tiles across v7x's 2 TCs
        ),
    )(crd32, freq_x, freq_y, cos_mask)


def _reference(crd, num_channels=256, min_period=0.001, max_period=10.0):
    """Pure-JAX reference mirroring the PyTorch code path exactly."""
    B = crd.shape[0]
    half_dim = num_channels // 4
    period = jnp.exp(
        jnp.linspace(math.log(min_period), math.log(max_period), half_dim, dtype=jnp.float32)
    )
    pos = crd.reshape(-1).astype(jnp.float32)            # flatten -> (2B,)
    out = pos[:, None] * (2.0 * math.pi / period)        # (2B, half_dim)
    emb = jnp.concatenate([jnp.sin(out), jnp.cos(out)], axis=-1)   # (2B, 2*half_dim)
    return emb.reshape(B, num_channels).astype(crd.dtype)


if __name__ == "__main__":
    B = 24
    NUM_CHANNELS = 256

    key = jax.random.PRNGKey(0)
    # coordinates in [0, 10) -- matches the kind of inputs the module expects
    crd = jax.random.uniform(key, (B, 2), dtype=jnp.float32) * 10.0

    # tile_b=8 exercises a multi-step parallel grid even at this small B.
    out = sincos_2d_pos_embed(crd, num_channels=NUM_CHANNELS, tile_b=8)
    out = jax.block_until_ready(out)

    ref = _reference(crd, num_channels=NUM_CHANNELS)
    assert out.shape == (B, NUM_CHANNELS), out.shape
    assert jnp.allclose(out, ref, atol=1e-5, rtol=1e-5), float(jnp.max(jnp.abs(out - ref)))

    print("KERNEL_OK")
</pallas_src>

<mosaic_0001>
module attributes {stable_mosaic.version = 11 : i64} {
  func.func @_sincos_pos_embed_kernel(%arg0: i32, %arg1: memref<8x2xf32, #tpu.memory_space<vmem>>, %arg2: memref<1x256xf32, #tpu.memory_space<vmem>>, %arg3: memref<1x256xf32, #tpu.memory_space<vmem>>, %arg4: memref<1x256xf32, #tpu.memory_space<vmem>>, %arg5: memref<8x256xf32, #tpu.memory_space<vmem>>) attributes {dimension_semantics = [#tpu.dimension_semantics<parallel>], iteration_bounds = array<i64: 3>, scalar_prefetch = 0 : i64, scratch_operands = 0 : i64, tpu.core_type = #tpu.core_type<tc>, window_params = [{transform_indices = @transform_0, window_bounds = array<i64: 8, 2>}, {pipeline_mode = #tpu.pipeline_mode<synchronous>, transform_indices = @transform_1, window_bounds = array<i64: 1, 256>}, {pipeline_mode = #tpu.pipeline_mode<synchronous>, transform_indices = @transform_2, window_bounds = array<i64: 1, 256>}, {pipeline_mode = #tpu.pipeline_mode<synchronous>, transform_indices = @transform_3, window_bounds = array<i64: 1, 256>}, {transform_indices = @transform_4, window_bounds = array<i64: 8, 256>}]} {
    %c0 = arith.constant 0 : index
    %c0_0 = arith.constant 0 : index
    %0 = vector.load %arg1[%c0, %c0_0] : memref<8x2xf32, #tpu.memory_space<vmem>>, vector<8x1xf32>
    %c0_1 = arith.constant 0 : index
    %c1 = arith.constant 1 : index
    %1 = vector.load %arg1[%c0_1, %c1] : memref<8x2xf32, #tpu.memory_space<vmem>>, vector<8x1xf32>
    %c0_2 = arith.constant 0 : index
    %c0_3 = arith.constant 0 : index
    %2 = vector.load %arg2[%c0_2, %c0_3] : memref<1x256xf32, #tpu.memory_space<vmem>>, vector<1x256xf32>
    %3 = vector.broadcast %0 : vector<8x1xf32> to vector<8x256xf32>
    %4 = vector.broadcast %2 : vector<1x256xf32> to vector<8x256xf32>
    %5 = arith.mulf %3, %4 : vector<8x256xf32>
    %c0_4 = arith.constant 0 : index
    %c0_5 = arith.constant 0 : index
    %6 = vector.load %arg3[%c0_4, %c0_5] : memref<1x256xf32, #tpu.memory_space<vmem>>, vector<1x256xf32>
    %7 = vector.broadcast %1 : vector<8x1xf32> to vector<8x256xf32>
    %8 = vector.broadcast %6 : vector<1x256xf32> to vector<8x256xf32>
    %9 = arith.mulf %7, %8 : vector<8x256xf32>
    %10 = arith.addf %5, %9 : vector<8x256xf32>
    %c0_6 = arith.constant 0 : index
    %c0_7 = arith.constant 0 : index
    %11 = vector.load %arg4[%c0_6, %c0_7] : memref<1x256xf32, #tpu.memory_space<vmem>>, vector<1x256xf32>
    %cst = arith.constant 5.000000e-01 : f32
    %12 = vector.broadcast %cst : f32 to vector<1x256xf32>
    %13 = arith.cmpf ogt, %11, %12 : vector<1x256xf32>
    %14 = math.cos %10 : vector<8x256xf32>
    %15 = math.sin %10 : vector<8x256xf32>
    %16 = vector.shape_cast %13 : vector<1x256xi1> to vector<1x256xi1>
    %17 = vector.broadcast %16 : vector<1x256xi1> to vector<8x256xi1>
    %18 = arith.select %17, %14, %15 : vector<8x256xi1>, vector<8x256xf32>
    %c0_8 = arith.constant 0 : index
    %c0_9 = arith.constant 0 : index
    %19 = vector.load %arg5[%c0_8, %c0_9] : memref<8x256xf32, #tpu.memory_space<vmem>>, vector<8x256xf32>
    tpu.vector_store %arg5[%c0_8, %c0_9], %18 {strides = array<i32>} : memref<8x256xf32, #tpu.memory_space<vmem>>, vector<8x256xf32>,
    return
  }
  func.func @transform_0(%arg0: i32) -> (i32, i32) {
    %c0_i32 = arith.constant 0 : i32
    %c0_i32_0 = arith.constant 0 : i32
    return %arg0, %c0_i32 : i32, i32
  }
  func.func @transform_1(%arg0: i32) -> (i32, i32) {
    %c0_i32 = arith.constant 0 : i32
    %c0_i32_0 = arith.constant 0 : i32
    %c0_i32_1 = arith.constant 0 : i32
    return %c0_i32, %c0_i32_0 : i32, i32
  }
  func.func @transform_2(%arg0: i32) -> (i32, i32) {
    %c0_i32 = arith.constant 0 : i32
    %c0_i32_0 = arith.constant 0 : i32
    %c0_i32_1 = arith.constant 0 : i32
    return %c0_i32, %c0_i32_0 : i32, i32
  }
  func.func @transform_3(%arg0: i32) -> (i32, i32) {
    %c0_i32 = arith.constant 0 : i32
    %c0_i32_0 = arith.constant 0 : i32
    %c0_i32_1 = arith.constant 0 : i32
    return %c0_i32, %c0_i32_0 : i32, i32
  }
  func.func @transform_4(%arg0: i32) -> (i32, i32) {
    %c0_i32 = arith.constant 0 : i32
    %c0_i32_0 = arith.constant 0 : i32
    return %arg0, %c0_i32 : i32, i32
  }
}

</mosaic_0001>

<bundles_post_ra>
// kernel: tpu_custom_call.1
= control target key start
LH: loop header
LB: loop body
LE: loop exit
PB: predicated region body
PF: predicated region fallthrough
CT: control target
= control target key end

     0   :  { %9 = vsyncpa [#allocation3], 0  ;;  %s1136_s0 = inlined_call_operand.vmem [shape: f32[24,2], index: 0, kind: input, shape index: {}]   ;;  %s1137_s1 = inlined_call_operand.vmem [shape: f32[1,256], index: 1, kind: input, shape index: {}]   ;;  %s1138_s2 = inlined_call_operand.vmem [shape: f32[1,256], index: 2, kind: input, shape index: {}]   ;;  %s1139_s3 = inlined_call_operand.vmem [shape: f32[1,256], index: 3, kind: input, shape index: {}]   ;;  %s1140_s4 = inlined_call_operand.hbm [shape: f32[24,256], index: 4, kind: output, shape index: {}]  }
   0x1   :  { %11 = vsyncpa [#allocation3 + $0x1], 0  ;;  %s929_s15 = smov 0   ;;  %s931_s16 = smov 0  }
   0x2   :  { %s933_s17 = smov 0   ;;  %s935_s18 = smov 0  }
   0x3 LB: > { %s950_s19 = sadd.s32 4294967295, %s893_s18   ;;  %s738_s20 = sadd.s32 4294967294, %s893_s18   ;;  %s893_s18 = sphi %s935_s18, %s1150_s18   ;;  %s889_s17 = sphi %s933_s17, %s1149_s17   ;;  %s885_s16 = sphi %s931_s16, %s1148_s16   ;;  %s881_s15 = sphi %s929_s15, %s1147_s15  }
   0x4   : > { %s954_s21 = sadd.s32 1, %s893_s18   ;;  %s113_s22 = sadd.s32 1, %s889_s17 }
   0x5   : > { %s110_s23 = ssub.s32 %s893_s18, %s954_s21  ;;  %p123_p0 = scmp.ne.s32.totalorder %s889_s17, %s885_s16 }
   0x6   : > { %p111_p1 = scmp.eq.s32.totalorder %s110_s23, 0  ;;  %p124_p2 = scmp.eq.s32.totalorder %s950_s19, 2 }
   0x7   : > { %p129_p3 = scmp.ne.s32.totalorder %s885_s16, %s881_s15  ;;  %p130_p4 = scmp.eq.s32.totalorder %s738_s20, 2 }
   0x8   : > { %s965_s24 = scalar_select %p111_p1, %s889_s17, %s113_s22  }
   0x9   : > { %p967_p5 = por %p124_p2, %p123_p0  ;;  %p971_p6 = por %p130_p4, %p129_p3 }
   0xa   : > { %p741_p7 = scmp.ge.s32.totalorder %s893_s18, 1  ;;  %p164_p8 = scmp.lt.s32.totalorder %s893_s18, 4 }
   0xc   : > { %p165_p9 = pnand %p741_p7, %p164_p8 }
   0xd   : > { %v201_v0 = vlaneseq (!%p165_p9)  ;;  %v233_v1 = vld [vmem:[%s1139_s3] sm:$0x3] (!%p165_p9)  ;;  %p189_p10 = scmp.lt.s32.totalorder (!%p165_p9), %s950_s19, 2  ;;  %v895_v2 = vmov (!%p165_p9), 0   ;;  %v896_v10 = vmov (!%p165_p9), 1   ;;  %s186_s12 = sand.u32 (!%p165_p9), 1, %s885_s16  }
   0xe   : > { %168 = sbr.rel (%p165_p9) target bundleno = 267 (0x10b), region = 36  ;;  %vm234_vm0 = vcmp.gt.f32.partialorder (!%p165_p9), %v233_v1, 0.5  ;;  %821 = vset.pattern.permute.xlu0 (!%p165_p9), %v895_v2  ;;  %v194_v11 = vld [vmem:[%s1137_s1] sm:$0x3] (!%p165_p9)  ;;  %v897_v45 = vmov (!%p165_p9), 683565275  }
   0xf   : > { %v202_v3 = vshrl.u32 (!%p165_p9), %v201_v0, 7  ;;  %v982_v4 = vsel (!%p165_p9), %vm234_vm0, 1, %v895_v2  ;;  %v213_v12 = vld [vmem:[%s1138_s2] sm:$0x3] (!%p165_p9)  ;;  %v898_v49 = vmov (!%p165_p9), 2475754826  }
  0x10   : > { %v899_v51 = vmov (!%p165_p9), 2131351028   ;;  %v900_v53 = vmov (!%p165_p9), 2102212464   ;;  %v901_v55 = vmov (!%p165_p9), 920167782  }
  0x11   : > { %v984_v5 = vsub.s32 (!%p165_p9), 0, %v202_v3  ;;  %v986_v6 = vsub.s32 (!%p165_p9), 1, %v202_v3  ;;  %v902_v62 = vmov (!%p165_p9), 1326507024   ;;  %s742_s13 = sshll.u32 (!%p165_p9), %s186_s12, 4  ;;  %s765_s20 = sshll.u32 (!%p165_p9), %s950_s19, 8 }
  0x12   : > { %s188_s14 = scalar_lea.vmem (!%p165_p9), [#allocation2], %s742_s13  ;;  %s1090_s28 = scalar_lea.hbm (!%p165_p9), %s1140_s4, %s765_s20 }
  0x13   : > { %v653_v7 = vrot.slane (!%p165_p9), %v982_v4, %v984_v5  ;;  %v657_v8 = vrot.slane (!%p165_p9), %v982_v4, %v986_v6  ;;  %v204_v14 = vrot.slane (!%p165_p9), %v194_v11, %v984_v5  ;;  %v208_v15 = vrot.slane (!%p165_p9), %v194_v11, %v986_v6  ;;  %s679_s22 = sshll.u32 (!%p165_p9), %s188_s14, 4  ;;  %s1092_s22 = int_to_ptr.vmem [resolvable:$true] %s679_s22 }
  0x14   : > { %v222_v16 = vrot.slane (!%p165_p9), %v213_v12, %v984_v5  ;;  %v226_v17 = vrot.slane (!%p165_p9), %v213_v12, %v986_v6 }
  0x15   : > { %s190_s29 = scalar_select %p189_p10, %s950_s19, 2 }
  0x16   : > { %s665_s19 = scalar_lea.sflag [#allocation3], %s186_s12 }
  0x17   : > { %s743_s30 = sshll.u32 %s190_s29, 3  ;;  %s831_s29 = scalar_lea.vmem %s1092_s22, 256 }
  0x18   : > { %s192_s7 = scalar_lea.vmem %s1136_s0, %s743_s30  ;;  %p832_p11 = scmp.ne.s32.totalorder %s1092_s22, %s831_s29 }
  0x19   : > { %v193_v9 = vld [vmem:[%s192_s7] sm:$0xff]  ;;  %s903_s30 = smov [#allocation2]  }
  0x1a   : > { %197 = vperm.xlu0 %821, %v193_v9   ;;  %p833_p12 = pnand %p832_p11, %p967_p5  ;;  %s835_s5 = sshll.u32 %s903_s30, 4  ;;  %s836_s5 = int_to_ptr.vmem [resolvable:$false] %s835_s5 }
  0x1b   : > { %s837_s6 = scalar_lea.vmem %s836_s5, 512  ;;  %p838_p0 = scmp.lt.s32.totalorder %s1092_s22, %s836_s5 }
  0x1c   : > { %p834_p13 = pneg %p833_p12  ;;  %p839_p1 = scmp.lt.s32.totalorder %s837_s6, %s831_s29 }
  0x1e   : > { %822 = vset.pattern.permute.xlu0 %v896_v10  ;;  %p840_p2 = por %p839_p1, %p838_p0 }
  0x1f   : > { %215 = vperm.xlu0 %822, %v193_v9  }
  0x20   : > { %p841_p3 = pnand %p840_p2, %p834_p13 }
  0x99   : > { %v198_v13 = vpop.permute.xlu0 %197 }
  0x9a   : > { %v211_v19 = vmul.f32 %v204_v14, %v198_v13  ;;  %v212_v20 = vmul.f32 %v208_v15, %v198_v13 }
  0x9e   : > { %v216_v18 = vpop.permute.xlu0 %215 }
  0x9f   : > { %v229_v21 = vmul.f32 %v222_v16, %v216_v18  ;;  %v230_v22 = vmul.f32 %v226_v17, %v216_v18 }
  0xa1   : > { %v1005_v23 = vadd.f32 %v229_v21, %v211_v19  ;;  %v1007_v24 = vadd.f32 %v230_v22, %v212_v20 }
  0xa3   : > { %v235_v25 = vand.u32 2147483647, %v1005_v23  ;;  %v238_v26 = vand.u32 2139095040, %v1005_v23  ;;  %v341_v27 = vand.u32 2139095040, %v1007_v24  ;;  %v338_v30 = vand.u32 2147483647, %v1007_v24 }
  0xa4   : > { %vm237_vm15 = vcmp.lt.s32.totalorder %v1005_v23, 0 }
  0xa5   : > { %v239_v28 = vshrl.u32 %v238_v26, 23  ;;  %v242_v29 = vand.u32 8388607, %v235_v25  ;;  %v342_v31 = vshrl.u32 %v341_v27, 23  ;;  %v1017_v36 = vand.u32 8388607, %v338_v30 }
  0xa6   : > { %vm236_vm0 = vcmp.le.f32.partialorder %v235_v25, 0.7853982 }
  0xa7   : > { %v744_v32 = vadd.s32 4294967169, %v239_v28  ;;  %v748_v33 = vadd.s32 4294967169, %v342_v31  ;;  %v243_v35 = vor.u32 8388608, %v242_v29  ;;  %v346_v43 = vor.u32 8388608, %v1017_v36 }
  0xa9   : > { %v245_v34 = vadd.s32 1, %v744_v32  ;;  %v348_v37 = vadd.s32 1, %v748_v33  ;;  %v1019_v42 = vshll.u32 %v243_v35, 8 }
  0xab   : > { %vm246_vm1 = vcmp.gt.s32.totalorder %v245_v34, 0  ;;  %vm349_vm2 = vcmp.gt.s32.totalorder %v348_v37, 0 }
  0xac   : > { %v247_v38 = vsel %vm246_vm1, %v245_v34, 0  ;;  %v350_v41 = vsel %vm349_vm2, %v348_v37, 0  ;;  %vm340_vm1 = vcmp.lt.s32.totalorder %v1007_v24, 0  ;;  %vm339_vm2 = vcmp.le.f32.partialorder %v338_v30, 0.7853982 }
  0xad   : > { %v248_v39 = vshrl.u32 %v247_v38, 5  ;;  %v249_v40 = vand.u32 31, %v247_v38  ;;  %v1022_v47 = vshrl.u32 %v350_v41, 5  ;;  %v352_v48 = vand.u32 31, %v350_v41 }
  0xaf   : > { %v250_v44 = vsub.s32 32, %v249_v40  ;;  %v252_v46 = vshll.u32 %v897_v45, %v249_v40  ;;  %v255_v50 = vshll.u32 %v898_v49, %v249_v40  ;;  %v258_v52 = vshll.u32 %v899_v51, %v249_v40 }
  0xb0   : > { %v261_v54 = vshll.u32 %v900_v53, %v249_v40  ;;  %v264_v56 = vshll.u32 %v901_v55, %v249_v40  ;;  %vm267_vm3 = vcmp.lt.s32.totalorder %v248_v39, 1  ;;  %vm268_vm4 = vcmp.lt.s32.totalorder %v248_v39, 2 }
  0xb1   : > { %v253_v57 = vshrl.u32 %v898_v49, %v250_v44  ;;  %v256_v58 = vshrl.u32 %v899_v51, %v250_v44  ;;  %v259_v59 = vshrl.u32 %v900_v53, %v250_v44  ;;  %v251_v60 = vshrl.u32 %v897_v45, %v250_v44 }
  0xb2   : > { %v262_v61 = vshrl.u32 %v901_v55, %v250_v44  ;;  %v265_v63 = vshrl.u32 %v902_v62, %v250_v44  ;;  %v353_v3 = vsub.s32 32, %v352_v48  ;;  %vm269_vm5 = vcmp.lt.s32.totalorder %v248_v39, 3 }
  0xb3   : > { %v254_v0 = vor.u32 %v253_v57, %v252_v46  ;;  %v257_v1 = vor.u32 %v256_v58, %v255_v50  ;;  %v260_v2 = vor.u32 %v259_v59, %v258_v52  ;;  %vm270_vm6 = vcmp.lt.s32.totalorder %v248_v39, 4 }
  0xb4   : > { %v263_v9 = vor.u32 %v262_v61, %v261_v54  ;;  %v266_v10 = vor.u32 %v265_v63, %v264_v56  ;;  %v355_v18 = vshll.u32 %v897_v45, %v352_v48  ;;  %v356_v21 = vshrl.u32 %v898_v49, %v353_v3 }
  0xb5   : > { %v271_v11 = vsel %vm267_vm3, %v251_v60, %v254_v0  ;;  %v272_v12 = vsel %vm270_vm6, %v260_v2, 2102212464  ;;  %v275_v13 = vsel %vm267_vm3, %v254_v0, %v257_v1  ;;  %v279_v14 = vsel %vm267_vm3, %v257_v1, %v260_v2 }
  0xb6   : > { %v273_v15 = vsel %vm269_vm5, %v257_v1, %v272_v12  ;;  %v276_v16 = vsel %vm270_vm6, %v263_v9, 920167782  ;;  %v280_v17 = vsel %vm270_vm6, %v266_v10, 1326507024  ;;  %v358_v22 = vshll.u32 %v898_v49, %v352_v48 }
  0xb7   : > { %v277_v19 = vsel %vm269_vm5, %v260_v2, %v276_v16  ;;  %v281_v20 = vsel %vm269_vm5, %v263_v9, %v280_v17  ;;  %v274_v26 = vsel %vm268_vm4, %v271_v11, %v273_v15  ;;  %v359_v29 = vshrl.u32 %v899_v51, %v353_v3 }
  0xb8   : > { %v278_v27 = vsel %vm268_vm4, %v275_v13, %v277_v19  ;;  %v282_v28 = vsel %vm268_vm4, %v279_v14, %v281_v20  ;;  %v357_v35 = vor.u32 %v356_v21, %v355_v18  ;;  %v361_v37 = vshll.u32 %v899_v51, %v352_v48 }
  0xb9   : > { %v1031_v31 = vmul.u32.u64.low %v1019_v42, %v282_v28  ;;  %v1032_v32 = vmul.u32.u64.high %v1019_v42, %v282_v28, %v1031_v31  ;;  %v1035_v33 = vmul.u32.u64.low %v1019_v42, %v278_v27  ;;  %v1036_v34 = vmul.u32.u64.high %v1019_v42, %v278_v27, %v1035_v33 }
  0xba   : > { %v360_v36 = vor.u32 %v359_v29, %v358_v22  ;;  %v362_v38 = vshrl.u32 %v900_v53, %v353_v3  ;;  %v364_v40 = vshll.u32 %v900_v53, %v352_v48  ;;  %v365_v41 = vshrl.u32 %v901_v55, %v353_v3 }
  0xbb   : > { %v368_v44 = vshrl.u32 %v902_v62, %v353_v3  ;;  %v386_v46 = vshll.u32 %v346_v43, 8  ;;  %v290_v39 = vmul.u32 %v1019_v42, %v274_v26  ;;  %v354_v49 = vshrl.u32 %v897_v45, %v353_v3 }
  0xbc   : > { %v363_v50 = vor.u32 %v362_v38, %v361_v37  ;;  %v367_v52 = vshll.u32 %v901_v55, %v352_v48  ;;  %vm292_vm7 = vc.u32 %v1032_v32, %v1035_v33  ;;  %v293_v54 = vadd.s32 1, %v1036_v34 }
  0xbd   : > { %v366_v56 = vor.u32 %v365_v41, %v364_v40  ;;  %vm370_vm8 = vcmp.lt.s32.totalorder %v1022_v47, 1  ;;  %vm372_vm9 = vcmp.lt.s32.totalorder %v1022_v47, 3  ;;  %vm373_vm10 = vcmp.lt.s32.totalorder %v1022_v47, 4 }
  0xbe   : > { %v369_v57 = vor.u32 %v368_v44, %v367_v52  ;;  %v378_v51 = vsel %vm370_vm8, %v357_v35, %v360_v36  ;;  %v294_v43 = vsel %vm292_vm7, %v293_v54, %v1036_v34  ;;  %v375_v53 = vsel %vm373_vm10, %v363_v50, 2102212464 }
  0xbf   : > { %v379_v42 = vsel %vm373_vm10, %v366_v56, 920167782  ;;  %v382_v45 = vsel %vm370_vm8, %v360_v36, %v363_v50  ;;  %v295_v58 = vadd.s32 %v294_v43, %v290_v39  ;;  %vm371_vm11 = vcmp.lt.s32.totalorder %v1022_v47, 2 }
  0xc0   : > { %v380_v48 = vsel %vm372_vm9, %v363_v50, %v379_v42  ;;  %v383_v55 = vsel %vm373_vm10, %v369_v57, 1326507024  ;;  %v374_v59 = vsel %vm370_vm8, %v354_v49, %v357_v35  ;;  %v376_v60 = vsel %vm372_vm9, %v360_v36, %v375_v53 }
  0xc1   : > { %v381_v61 = vsel %vm371_vm11, %v378_v51, %v380_v48  ;;  %v384_v62 = vsel %vm372_vm9, %v366_v56, %v383_v55  ;;  %v296_v63 = vadd.s32 536870912, %v295_v58  ;;  %v377_v11 = vsel %vm371_vm11, %v374_v59, %v376_v60 }
  0xc2   : > { %v385_v0 = vsel %vm371_vm11, %v382_v45, %v384_v62  ;;  %v1046_v1 = vmul.u32.u64.low %v386_v46, %v381_v61  ;;  %v1047_v2 = vmul.u32.u64.high %v386_v46, %v381_v61, %v1046_v1  ;;  %v393_v47 = vmul.u32 %v386_v46, %v377_v11 }
  0xc3   : > { %v1049_v3 = vmul.u32.u64.low %v386_v46, %v385_v0  ;;  %v1050_v9 = vmul.u32.u64.high %v386_v46, %v385_v0, %v1049_v3  ;;  %v297_v10 = vshrl.u32 %v296_v63, 30  ;;  %v291_v31 = vadd.s32 %v1035_v33, %v1032_v32 }
  0xc4   : > { %v396_v13 = vadd.s32 1, %v1047_v2  ;;  %vm1069_vm3 = vcmp.eq.s32.totalorder %v653_v7, 1  ;;  %vm327_vm10 = vweird.f32 %v1005_v23  ;;  %vm1081_vm11 = vcmp.eq.s32.totalorder %v657_v8, 1 }
  0xc5   : > { %v298_v12 = vshll.u32 %v297_v10, 30  ;;  %vm395_vm12 = vc.u32 %v1050_v9, %v1046_v1  ;;  %v394_v56 = vadd.s32 %v1046_v1, %v1050_v9  ;;  %v321_v33 = vsub.s32 4, %v297_v10 }
  0xc6   : > { %v397_v15 = vsel %vm395_vm12, %v396_v13, %v1047_v2 }
  0xc7   : > { %v299_v14 = vsub.s32 %v295_v58, %v298_v12  ;;  %v398_v16 = vadd.s32 %v397_v15, %v393_v47  ;;  %v322_v59 = vsel %vm237_vm15, %v321_v33, %v297_v10 }
  0xc8   : > { %v324_v0 = vsel %vm236_vm0, 0, %v322_v59 }
  0xc9   : > { %v301_v17 = vsub.s32 0, %v299_v14  ;;  %v399_v18 = vadd.s32 536870912, %v398_v16  ;;  %v534_v3 = vadd.s32 3, %v324_v0  ;;  %v328_v12 = vand.u32 3, %v324_v0 }
  0xcb   : > { %v745_v19 = vmin.u32 %v301_v17, %v299_v14  ;;  %v400_v20 = vshrl.u32 %v399_v18, 30  ;;  %v535_v13 = vand.u32 3, %v534_v3  ;;  %vm330_vm4 = vcmp.eq.s32.totalorder %v328_v12, 0 }
  0xcc   : > { %vm333_vm5 = vcmp.eq.s32.totalorder %v328_v12, 2  ;;  %vm329_vm8 = vcmp.lt.s32.totalorder %v328_v12, 2 }
  0xcd   : > { %v303_v21 = vclz %v745_v19  ;;  %v401_v22 = vshll.u32 %v400_v20, 30  ;;  %v424_v2 = vsub.s32 4, %v400_v20  ;;  %vm540_vm6 = vcmp.eq.s32.totalorder %v535_v13, 2 }
  0xce   : > { %vm537_vm7 = vcmp.eq.s32.totalorder %v535_v13, 0  ;;  %vm536_vm9 = vcmp.lt.s32.totalorder %v535_v13, 2 }
  0xcf   : > { %v746_v26 = vadd.s32 4294967294, %v303_v21  ;;  %v402_v27 = vsub.s32 %v398_v16, %v401_v22  ;;  %v425_v10 = vsel %vm340_vm1, %v424_v2, %v400_v20 }
  0xd1   : > { %vm747_vm13 = vcmp.lt.s32.totalorder %v746_v26, 0  ;;  %v404_v29 = vsub.s32 0, %v402_v27 }
  0xd2   : > { %v306_v28 = vsel %vm747_vm13, 0, %v746_v26 }
  0xd3   : > { %v307_v34 = vsub.s32 32, %v306_v28  ;;  %v311_v35 = vsub.s32 4294967266, %v306_v28  ;;  %v749_v36 = vmin.u32 %v404_v29, %v402_v27  ;;  %v308_v37 = vshll.u32 %v299_v14, %v306_v28 }
  0xd4   : > { %v427_v14 = vsel %vm339_vm2, 0, %v425_v10 }
  0xd5   : > { %v309_v38 = vshrl.u32 %v291_v31, %v307_v34  ;;  %v312_v40 = vadd.s32 127, %v311_v35  ;;  %v406_v41 = vclz %v749_v36  ;;  %v638_v20 = vadd.s32 3, %v427_v14 }
  0xd6   : > { %v431_v28 = vand.u32 3, %v427_v14 }
  0xd7   : > { %v310_v44 = vor.u32 %v309_v38, %v308_v37  ;;  %v313_v46 = vshll.u32 %v312_v40, 23  ;;  %v750_v39 = vadd.s32 4294967294, %v406_v41  ;;  %v639_v29 = vand.u32 3, %v638_v20 }
  0xd8   : > { %vm436_vm12 = vcmp.eq.s32.totalorder %v431_v28, 2 }
  0xd9   : > { %v314_v49 = vor.u32 4788187, %v313_v46  ;;  %vm751_vm14 = vcmp.lt.s32.totalorder %v750_v39, 0  ;;  %v317_v52 = vcvt.s32.f32 %v310_v44  ;;  %vm644_vm13 = vcmp.eq.s32.totalorder %v639_v29, 2 }
  0xda   : > { %v409_v54 = vsel %vm751_vm14, 0, %v750_v39  ;;  %vm433_vm14 = vcmp.eq.s32.totalorder %v431_v28, 0 }
  0xdb   : > { %v315_v50 = vand.u32 2147483647, %v314_v49  ;;  %v410_v57 = vsub.s32 32, %v409_v54  ;;  %v414_v51 = vsub.s32 4294967266, %v409_v54  ;;  %v411_v43 = vshll.u32 %v402_v27, %v409_v54 }
  0xdd   : > { %v318_v32 = vmul.f32 %v317_v52, %v315_v50  ;;  %v412_v53 = vshrl.u32 %v394_v56, %v410_v57  ;;  %v415_v42 = vadd.s32 127, %v414_v51 }
  0xdf   : > { %v319_v45 = vxor.u32 2147483648, %v318_v32  ;;  %v413_v58 = vor.u32 %v412_v53, %v411_v43  ;;  %v416_v48 = vshll.u32 %v415_v42, 23 }
  0xe1   : > { %v320_v55 = vsel %vm237_vm15, %v319_v45, %v318_v32  ;;  %v417_v61 = vor.u32 4788187, %v416_v48  ;;  %v420_v63 = vcvt.s32.f32 %v413_v58  ;;  %vm641_vm15 = vcmp.eq.s32.totalorder %v639_v29, 0 }
  0xe2   : > { %v323_v60 = vsel %vm236_vm0, %v1005_v23, %v320_v55  ;;  %vm432_vm0 = vcmp.lt.s32.totalorder %v431_v28, 2 }
  0xe3   : > { %823 = vcosq.f32 %v323_v60  ;;  %v418_v62 = vand.u32 2147483647, %v417_v61 }
  0xe4   : > { %825 = vsinq.f32 %v323_v60 }
  0xe5   : > { %v421_v1 = vmul.f32 %v420_v63, %v418_v62 }
  0xe7   : > { %v422_v9 = vxor.u32 2147483648, %v421_v1 }
  0xe9   : > { %v423_v25 = vsel %vm340_vm1, %v422_v9, %v421_v1  ;;  %vm640_vm1 = vcmp.lt.s32.totalorder %v639_v29, 2 }
  0xea   : > { %v426_v11 = vsel %vm339_vm2, %v1007_v24, %v423_v25  ;;  %vm430_vm2 = vweird.f32 %v1007_v24 }
  0xeb   : > { %827 = vcosq.f32 %v426_v11 }
  0xec   : > { %829 = vsinq.f32 %v426_v11 }
  0xed   : > { %v824_v47 = vpop.eup %823 }
  0xee   : > { %v826_v15 = vpop.eup %825  ;;  %v334_v30 = vxor.u32 2147483648, %v824_v47 }
  0xef   : > { %v331_v17 = vxor.u32 2147483648, %v826_v15 }
  0xf0   : > { %v335_v18 = vsel %vm333_vm5, %v334_v30, %v826_v15  ;;  %v542_v19 = vsel %vm540_vm6, %v334_v30, %v826_v15 }
  0xf1   : > { %v332_v21 = vsel %vm330_vm4, %v824_v47, %v331_v17  ;;  %v539_v22 = vsel %vm537_vm7, %v824_v47, %v331_v17 }
  0xf2   : > { %v336_v5 = vsel %vm329_vm8, %v332_v21, %v335_v18  ;;  %v543_v7 = vsel %vm536_vm9, %v539_v22, %v542_v19 }
  0xf3   : > { %v337_v26 = vsel %vm327_vm10, nan, %v336_v5  ;;  %v544_v27 = vsel %vm327_vm10, nan, %v543_v7 }
  0xf4   : > { %v660_v31 = vsel %vm1069_vm3, %v337_v26, %v544_v27 }
  0xf5   : > { %662 = vst [vmem:[%s188_s14] sm:$0xff] %v660_v31  ;;  %v828_v34 = vpop.eup %827 }
  0xf6   : > { %v830_v35 = vpop.eup %829  ;;  %v437_v36 = vxor.u32 2147483648, %v828_v34 }
  0xf7   : > { %v434_v37 = vxor.u32 2147483648, %v830_v35 }
  0xf8   : > { %v438_v38 = vsel %vm436_vm12, %v437_v36, %v830_v35  ;;  %v646_v40 = vsel %vm644_vm13, %v437_v36, %v830_v35 }
  0xf9   : > { %v435_v41 = vsel %vm433_vm14, %v828_v34, %v434_v37  ;;  %v643_v44 = vsel %vm641_vm15, %v828_v34, %v434_v37 }
  0xfa   : > { %v439_v4 = vsel %vm432_vm0, %v435_v41, %v438_v38  ;;  %v647_v6 = vsel %vm640_vm1, %v643_v44, %v646_v40 }
  0xfb   : > { %v440_v8 = vsel %vm430_vm2, nan, %v439_v4  ;;  %v648_v46 = vsel %vm430_vm2, nan, %v647_v6 }
  0xfc   : > { %v661_v39 = vsel %vm1081_vm11, %v440_v8, %v648_v46 }
  0xfd   : > { %663 = vst [vmem:[%s188_s14 + $0x8] sm:$0xff] %v661_v39 }
  0xfe   : > { %844 = shalt.err (!%p841_p3)
}
  0xff   : > { %s845_s7 = scalar_lea.hbm %s1090_s28, 256  ;;  %s849_s10 = scalar_lea.hbm %s1140_s4, 768 }
 0x100   : > { %p846_p4 = scmp.ne.s32.totalorder %s1090_s28, %s845_s7  ;;  %p850_p9 = scmp.lt.u32.totalorder %s1090_s28, %s1140_s4 }
 0x101   : > { %p851_p10 = scmp.lt.u32.totalorder %s849_s10, %s845_s7  ;;  %p853_p12 = scmp.lt.u32.totalorder %s845_s7, %s1090_s28 }
 0x102   : > { %p847_p7 = pnand %p846_p4, %p967_p5 }
 0x103   : > { %p852_p11 = por %p851_p10, %p850_p9 }
 0x104   : > { %p848_p8 = pneg %p847_p7 }
 0x105   : > { %p854_p13 = por %p853_p12, %p852_p11 }
 0x107   : > { %p855_p0 = pnand %p854_p13, %p848_p8 }
 0x109   : > { %858 = shalt.err (!%p855_p0)
}
 0x10a   : > { %774 = dma.vmem_to_hbm [thread:$0]  (%p967_p5), %s1092_s22, 256, %s1090_s28, %s665_s19  }
 0x10b PF: > { %p780_p1 = scmp.ge.s32.totalorder %s893_s18, 2  ;;  %s691_s13 = sand.u32 1, %s881_s15  }
 0x10c   : > { %s692_s14 = scalar_lea.sflag [#allocation3], %s691_s13 }
 0x10d   : > { %p777_p2 = pnand %p780_p1, %p971_p6 }
 0x10f   : > { %876 = dma.done.wait (!%p777_p2), %s692_s14, 256  }
 0x110   : > { %878 = vsyncadd (!%p777_p2), %s692_s14, 4294967040  ;;  %p14_p3 = scmp.ge.s32.totalorder %s954_s21, 5   ;;  %s1147_s15 = smov %s885_s16 }
 0x111   : > { %s1148_s16 = smov %s889_s17  ;;  %s1149_s17 = smov %s965_s24 }
 0x112   : > { %s1150_s18 = smov %s954_s21  ;;  %16 = sbr.rel (!%p14_p3) target bundleno = 3 (0x3), region = 71 }
 0x119   :  { %697 = vsyncpa [#allocation3], 1 }
 0x11a   :  { %699 = vsyncpa [#allocation3 + $0x1], 1 }

</bundles_post_ra>
